<compile_context>
chip_gen: v5e
topology: v5e:2x2
jax: 0.10.0
libtpu: 0.0.40
codegen_flags: <defaults>
</compile_context>

<pallas_src>
import functools

import jax
import jax.numpy as jnp
import numpy as np
from jax.experimental import pallas as pl
from jax.experimental.pallas import tpu as pltpu


def _round_up(x, m):
    return ((x + m - 1) // m) * m


def ae3_kernel(x_ref, w1_ref, b1_ref, w234_ref, b234_ref, out_ref):
    # x_ref: [TB, n_pixels] f32, w1_ref: [n_pixels, 64] bf16, b1_ref: [1, 64] f32
    # w234_ref: [64, n_pixels] bf16, b234_ref: [1, n_pixels] f32
    x = x_ref[...].astype(jnp.bfloat16)           # in-kernel cast (free under DMA slack)
    h = jnp.dot(x, w1_ref[...],
                preferred_element_type=jnp.float32) + b1_ref[...]
    h = jnp.maximum(h, 0.0)                       # ReLU in f32
    out = jnp.dot(h.astype(jnp.bfloat16), w234_ref[...],
                  preferred_element_type=jnp.float32) + b234_ref[...]
    out_ref[...] = out.astype(out_ref.dtype)


def fold_params(params):
    """Fold the activation-free layers 2/3/4 in f32, then cast matmul operands to bf16.

    W234 = w2 @ w3 @ w4 is a rank-<=8 product; the fold is done in f32 and only
    the final [64, n_pixels] matrix is cast to bf16 (small entries lose a little
    precision vs. the unfused f32 PyTorch reference).
    """
    w1, b1 = params["w1"], params["b1"]           # [n_pixels, 64], [1, 64]
    w2, b2 = params["w2"], params["b2"]           # [64, 8],        [1, 8]
    w3, b3 = params["w3"], params["b3"]           # [8, 64],        [1, 64]
    w4, b4 = params["w4"], params["b4"]           # [64, n_pixels], [1, n_pixels]

    w234 = (w2 @ w3) @ w4                         # [64, n_pixels]
    b234 = (b2 @ w3) @ w4 + b3 @ w4 + b4          # [1, n_pixels]
    return dict(
        w1=w1.astype(jnp.bfloat16),
        b1=b1.astype(jnp.float32),
        w234=w234.astype(jnp.bfloat16),
        b234=b234.astype(jnp.float32),
    )


def _choose_tile(batch, n_pixels, tb_cap_req, out_bytes):
    """Pick a batch tile: multiple of 16, fits VMEM budget, >=2 grid steps if possible."""
    vmem_budget = 20 << 20                        # data-tile budget (under 32 MiB scoped)
    per_row = 2 * n_pixels * (4 + out_bytes)      # double-buffered f32 x + out tiles
    tb_cap = max(16, (vmem_budget // per_row) // 16 * 16)
    tb_eff = min(tb_cap_req, tb_cap)
    if batch > 16:                                # let v7x's 2 TCs both get work
        tb_eff = min(tb_eff, _round_up(pl.cdiv(batch, 2), 16))
    tb_eff = min(tb_eff, _round_up(batch, 16))    # never wider than the (rounded) batch
    return max(16, tb_eff)


@functools.partial(jax.jit, static_argnames=("tb", "out_dtype"))
def ae3_forward(x, folded, *, tb=2048, out_dtype=jnp.bfloat16):
    """x: [batch, n_pixels] float32. folded: output of fold_params()."""
    batch, n_pixels = x.shape
    w1, b1 = folded["w1"], folded["b1"]
    w234, b234 = folded["w234"], folded["b234"]

    out_bytes = np.dtype(out_dtype).itemsize
    tb_eff = _choose_tile(batch, n_pixels, tb, out_bytes)
    n_tiles = pl.cdiv(batch, tb_eff)              # ragged last block: OOB rows dropped

    resident = lambda a: pl.BlockSpec(a.shape, lambda i: (0,) * a.ndim)

    cost = pl.CostEstimate(
        flops=4 * batch * n_pixels * 64,          # two [*, P]x[P,64]/[*,64]x[64,P] matmuls
        transcendentals=0,
        bytes_accessed=(batch * n_pixels * (4 + out_bytes)
                        + 2 * (n_pixels * 64 * 2)           # w1 + W234 (bf16)
                        + (64 + n_pixels) * 4),              # biases (f32)
    )

    out = pl.pallas_call(
        ae3_kernel,
        out_shape=jax.ShapeDtypeStruct((batch, n_pixels), out_dtype),
        grid=(n_tiles,),
        in_specs=[
            pl.BlockSpec((tb_eff, n_pixels), lambda i: (i, 0)),   # x tile (f32)
            resident(w1), resident(b1),                           # VMEM-resident weights
            resident(w234), resident(b234),
        ],
        out_specs=pl.BlockSpec((tb_eff, n_pixels), lambda i: (i, 0)),
        compiler_params=pltpu.CompilerParams(
            dimension_semantics=("parallel",),
            vmem_limit_bytes=32 << 20,            # v5e default scoped VMEM is only 16 MiB
        ),
        cost_estimate=cost,
    )(x, w1, b1, w234, b234)
    return out


def init_params(key, n_pixels):
    """Deterministic synthetic init (PyTorch-like uniform fan-in scaling), f32,
    weights stored pre-transposed as [in, out]."""
    ks = jax.random.split(key, 8)

    def linear(kw, kb, fan_in, fan_out):
        bound = 1.0 / np.sqrt(fan_in)
        w = jax.random.uniform(kw, (fan_in, fan_out), jnp.float32, -bound, bound)
        b = jax.random.uniform(kb, (1, fan_out), jnp.float32, -bound, bound)
        return w, b

    w1, b1 = linear(ks[0], ks[1], n_pixels, 64)
    w2, b2 = linear(ks[2], ks[3], 64, 8)
    w3, b3 = linear(ks[4], ks[5], 8, 64)
    w4, b4 = linear(ks[6], ks[7], 64, n_pixels)
    return dict(w1=w1, b1=b1, w2=w2, b2=b2, w3=w3, b3=b3, w4=w4, b4=b4)


def ae3_reference(x, p):
    """Unfused f32 reference matching the PyTorch module."""
    h1 = jnp.maximum(x @ p["w1"] + p["b1"], 0.0)
    z = h1 @ p["w2"] + p["b2"]
    h2 = z @ p["w3"] + p["b3"]
    return h2 @ p["w4"] + p["b4"]


if __name__ == "__main__":
    key = jax.random.PRNGKey(0)
    k_x, k_p = jax.random.split(key)

    # Flattened 16x16 images; batch chosen non-multiple of the tile to exercise
    # the ragged last grid block.
    batch, n_pixels = 40, 256
    x = jax.random.normal(k_x, (batch, n_pixels), jnp.float32)
    params = init_params(k_p, n_pixels)
    folded = fold_params(params)

    out = ae3_forward(x, folded)
    out = jax.block_until_ready(out)

    ref = ae3_reference(x, params)
    assert out.shape == (batch, n_pixels)
    # bf16 matmul operands + layer folding + bf16 output => looser tolerance
    # than the pure-f32 PyTorch reference.
    np.testing.assert_allclose(np.asarray(out).astype(np.float32),
                               np.asarray(ref), rtol=5e-2, atol=5e-2)

    print("KERNEL_OK")
</pallas_src>

<mosaic_0001>
module attributes {stable_mosaic.version = 11 : i64} {
  func.func @ae3_kernel(%arg0: i32, %arg1: memref<32x256xf32, #tpu.memory_space<vmem>>, %arg2: memref<256x64xbf16, #tpu.memory_space<vmem>>, %arg3: memref<1x64xf32, #tpu.memory_space<vmem>>, %arg4: memref<64x256xbf16, #tpu.memory_space<vmem>>, %arg5: memref<1x256xf32, #tpu.memory_space<vmem>>, %arg6: memref<32x256xbf16, #tpu.memory_space<vmem>>) attributes {dimension_semantics = [#tpu.dimension_semantics<parallel>], iteration_bounds = array<i64: 2>, scalar_prefetch = 0 : i64, scratch_operands = 0 : i64, tpu.core_type = #tpu.core_type<tc>, window_params = [{transform_indices = @transform_0, window_bounds = array<i64: 32, 256>}, {pipeline_mode = #tpu.pipeline_mode<synchronous>, transform_indices = @transform_1, window_bounds = array<i64: 256, 64>}, {pipeline_mode = #tpu.pipeline_mode<synchronous>, transform_indices = @transform_2, window_bounds = array<i64: 1, 64>}, {pipeline_mode = #tpu.pipeline_mode<synchronous>, transform_indices = @transform_3, window_bounds = array<i64: 64, 256>}, {pipeline_mode = #tpu.pipeline_mode<synchronous>, transform_indices = @transform_4, window_bounds = array<i64: 1, 256>}, {transform_indices = @transform_5, window_bounds = array<i64: 32, 256>}]} {
    %c0 = arith.constant 0 : index
    %c0_0 = arith.constant 0 : index
    %0 = vector.load %arg1[%c0, %c0_0] : memref<32x256xf32, #tpu.memory_space<vmem>>, vector<32x256xf32>
    %1 = arith.truncf %0 : vector<32x256xf32> to vector<32x256xbf16>
    %c0_1 = arith.constant 0 : index
    %c0_2 = arith.constant 0 : index
    %2 = vector.load %arg2[%c0_1, %c0_2] : memref<256x64xbf16, #tpu.memory_space<vmem>>, vector<256x64xbf16>
    %cst = arith.constant dense<0.000000e+00> : vector<32x64xf32>
    %3 = tpu.matmul %1, %2, %cst {dimension_numbers = #tpu.dot_dimension_numbers<[1], [0], [0], [1], [0, 0, 1, 1], [], []>} : vector<32x256xbf16>, vector<256x64xbf16>, vector<32x64xf32> -> vector<32x64xf32>
    %c0_3 = arith.constant 0 : index
    %c0_4 = arith.constant 0 : index
    %4 = vector.load %arg3[%c0_3, %c0_4] : memref<1x64xf32, #tpu.memory_space<vmem>>, vector<1x64xf32>
    %5 = vector.broadcast %4 : vector<1x64xf32> to vector<32x64xf32>
    %6 = arith.addf %3, %5 : vector<32x64xf32>
    %cst_5 = arith.constant 0.000000e+00 : f32
    %7 = vector.broadcast %cst_5 : f32 to vector<32x64xf32>
    %8 = arith.maximumf %6, %7 : vector<32x64xf32>
    %9 = arith.truncf %8 : vector<32x64xf32> to vector<32x64xbf16>
    %c0_6 = arith.constant 0 : index
    %c0_7 = arith.constant 0 : index
    %10 = vector.load %arg4[%c0_6, %c0_7] : memref<64x256xbf16, #tpu.memory_space<vmem>>, vector<64x256xbf16>
    %cst_8 = arith.constant dense<0.000000e+00> : vector<32x256xf32>
    %11 = tpu.matmul %9, %10, %cst_8 {dimension_numbers = #tpu.dot_dimension_numbers<[1], [0], [0], [1], [0, 0, 1, 1], [], []>} : vector<32x64xbf16>, vector<64x256xbf16>, vector<32x256xf32> -> vector<32x256xf32>
    %c0_9 = arith.constant 0 : index
    %c0_10 = arith.constant 0 : index
    %12 = vector.load %arg5[%c0_9, %c0_10] : memref<1x256xf32, #tpu.memory_space<vmem>>, vector<1x256xf32>
    %13 = vector.broadcast %12 : vector<1x256xf32> to vector<32x256xf32>
    %14 = arith.addf %11, %13 : vector<32x256xf32>
    %15 = arith.truncf %14 : vector<32x256xf32> to vector<32x256xbf16>
    %c0_11 = arith.constant 0 : index
    %c0_12 = arith.constant 0 : index
    %16 = vector.load %arg6[%c0_11, %c0_12] : memref<32x256xbf16, #tpu.memory_space<vmem>>, vector<32x256xbf16>
    tpu.vector_store %arg6[%c0_11, %c0_12], %15 {strides = array<i32>} : memref<32x256xbf16, #tpu.memory_space<vmem>>, vector<32x256xbf16>,
    return
  }
  func.func @transform_0(%arg0: i32) -> (i32, i32) {
    %c0_i32 = arith.constant 0 : i32
    %c0_i32_0 = arith.constant 0 : i32
    return %arg0, %c0_i32 : i32, i32
  }
  func.func @transform_1(%arg0: i32) -> (i32, i32) {
    %c0_i32 = arith.constant 0 : i32
    %c0_i32_0 = arith.constant 0 : i32
    %c0_i32_1 = arith.constant 0 : i32
    return %c0_i32, %c0_i32_0 : i32, i32
  }
  func.func @transform_2(%arg0: i32) -> (i32, i32) {
    %c0_i32 = arith.constant 0 : i32
    %c0_i32_0 = arith.constant 0 : i32
    %c0_i32_1 = arith.constant 0 : i32
    return %c0_i32, %c0_i32_0 : i32, i32
  }
  func.func @transform_3(%arg0: i32) -> (i32, i32) {
    %c0_i32 = arith.constant 0 : i32
    %c0_i32_0 = arith.constant 0 : i32
    %c0_i32_1 = arith.constant 0 : i32
    return %c0_i32, %c0_i32_0 : i32, i32
  }
  func.func @transform_4(%arg0: i32) -> (i32, i32) {
    %c0_i32 = arith.constant 0 : i32
    %c0_i32_0 = arith.constant 0 : i32
    %c0_i32_1 = arith.constant 0 : i32
    return %c0_i32, %c0_i32_0 : i32, i32
  }
  func.func @transform_5(%arg0: i32) -> (i32, i32) {
    %c0_i32 = arith.constant 0 : i32
    %c0_i32_0 = arith.constant 0 : i32
    return %arg0, %c0_i32 : i32, i32
  }
}

</mosaic_0001>

<bundles_post_ra>
// kernel: ae3_forward.1
= control target key start
LH: loop header
LB: loop body
LE: loop exit
PB: predicated region body
PF: predicated region fallthrough
CT: control target
= control target key end

     0   :  { %10 = vsyncpa [#allocation3], 0  ;;  %s1172_s0 = inlined_call_operand.vmem [shape: f32[40,256], index: 0, kind: input, shape index: {}]   ;;  %s1173_s1 = inlined_call_operand.vmem [shape: bf16[256,64], index: 1, kind: input, shape index: {}]   ;;  %s1174_s2 = inlined_call_operand.vmem [shape: f32[1,64], index: 2, kind: input, shape index: {}]   ;;  %s1175_s3 = inlined_call_operand.vmem [shape: bf16[64,256], index: 3, kind: input, shape index: {}]   ;;  %s1176_s4 = inlined_call_operand.vmem [shape: f32[1,256], index: 4, kind: input, shape index: {}]   ;;  %s1177_s5 = inlined_call_operand.hbm [shape: bf16[40,256], index: 5, kind: output, shape index: {}]  }
   0x1   :  { %12 = vsyncpa [#allocation3 + $0x1], 0  ;;  %s938_s18 = smov 0   ;;  %s940_s19 = smov 0  }
   0x2   :  { %s942_s20 = smov 0   ;;  %s944_s21 = smov 0  }
   0x3 LB: > { %s959_s22 = sadd.s32 4294967295, %s903_s21   ;;  %s642_s23 = sadd.s32 4294967294, %s903_s21   ;;  %s903_s21 = sphi %s944_s21, %s1184_s21   ;;  %s899_s20 = sphi %s942_s20, %s1183_s20   ;;  %s895_s19 = sphi %s940_s19, %s1182_s19   ;;  %s891_s18 = sphi %s938_s18, %s1181_s18  }
   0x4   : > { %s963_s24 = sadd.s32 1, %s903_s21   ;;  %s135_s25 = sadd.s32 1, %s899_s20 }
   0x5   : > { %s132_s26 = ssub.s32 %s903_s21, %s963_s24  ;;  %p145_p0 = scmp.ne.s32.totalorder %s899_s20, %s895_s19 }
   0x6   : > { %p133_p1 = scmp.eq.s32.totalorder %s132_s26, 0  ;;  %p146_p2 = scmp.eq.s32.totalorder %s959_s22, 1 }
   0x7   : > { %p151_p3 = scmp.ne.s32.totalorder %s895_s19, %s891_s18  ;;  %p152_p4 = scmp.eq.s32.totalorder %s642_s23, 1 }
   0x8   : > { %s974_s27 = scalar_select %p133_p1, %s899_s20, %s135_s25  }
   0x9   : > { %p976_p5 = por %p146_p2, %p145_p0  ;;  %p980_p6 = por %p152_p4, %p151_p3 }
   0xa   : > { %p645_p7 = scmp.ge.s32.totalorder %s903_s21, 1  ;;  %p202_p8 = scmp.lt.s32.totalorder %s903_s21, 3 }
   0xc   : > { %p203_p9 = pnand %p645_p7, %p202_p8 }
   0xd   : > { %s1005_s17 = sshll.u32 (!%p203_p9), %s959_s22, 2  ;;  %s233_s16 = sand.u32 (!%p203_p9), 1, %s895_s19  }
   0xe   : > { %206 = sbr.rel (%p203_p9) target bundleno = 385 (0x181), region = 40  ;;  %p242_p10 = scmp.lt.s32.totalorder (!%p203_p9), %s1005_s17, 4 }
   0xf   : > { %s646_s26 = sshll.u32 (!%p203_p9), %s233_s16, 5  ;;  %s1111_s6 = scalar_lea.sflag (!%p203_p9), [#allocation3], %s233_s16 }
  0x10   : > { %s1103_s30 = scalar_lea.vmem (!%p203_p9), [#allocation2], %s646_s26 }
  0x13   : > { %v769_v0 = vld [vmem:[%s1173_s1 + $0x38] sm:$0xff]  ;;  %v768_v2 = vld [vmem:[%s1173_s1 + $0x30] sm:$0xff]  ;;  %v767_v4 = vld [vmem:[%s1173_s1 + $0x28] sm:$0xff]  ;;  %s243_s10 = scalar_select %p242_p10, %s1005_s17, 4  ;;  %vm502_vm0 = vcmask 523264  }
  0x14   : > { %v777_v1 = vld [vmem:[%s1173_s1 + $0x78] sm:$0xff]  ;;  %404 = vmatpush.bf16.msra.mxu0 %v769_v0  ;;  %v776_v3 = vld [vmem:[%s1173_s1 + $0x70] sm:$0xff]  ;;  %v775_v5 = vld [vmem:[%s1173_s1 + $0x68] sm:$0xff] }
  0x15   : > { %423 = vmatpush.bf16.msra.mxu1 %v777_v1  ;;  %v766_v6 = vld [vmem:[%s1173_s1 + $0x20] sm:$0xff]  ;;  %v765_v8 = vld [vmem:[%s1173_s1 + $0x18] sm:$0xff]  ;;  %v764_v10 = vld [vmem:[%s1173_s1 + $0x10] sm:$0xff]  ;;  %s761_s15 = sshll.u32 %s243_s10, 4 }
  0x16   : > { %v774_v7 = vld [vmem:[%s1173_s1 + $0x60] sm:$0xff]  ;;  %v773_v9 = vld [vmem:[%s1173_s1 + $0x58] sm:$0xff]  ;;  %v772_v11 = vld [vmem:[%s1173_s1 + $0x50] sm:$0xff]  ;;  %s246_s7 = scalar_lea.vmem %s1172_s0, %s761_s15 }
  0x17   : > { %v763_v12 = vld [vmem:[%s1173_s1 + $0x8] sm:$0xff]  ;;  %v762_v14 = vld [vmem:[%s1173_s1] sm:$0xff]  ;;  %v262_v17 = vld [vmem:[%s246_s7 + $0x10] sm:$0xff] }
  0x18   : > { %405 = vmatpush.bf16.msra.mxu0 %v768_v2  ;;  %v771_v13 = vld [vmem:[%s1173_s1 + $0x48] sm:$0xff]  ;;  %v770_v15 = vld [vmem:[%s1173_s1 + $0x40] sm:$0xff]  ;;  %v263_v19 = vld [vmem:[%s246_s7 + $0x18] sm:$0xff] }
  0x19   : > { %424 = vmatpush.bf16.msra.mxu1 %v776_v3  ;;  %v260_v16 = vld [vmem:[%s246_s7] sm:$0xff]  ;;  %v261_v18 = vld [vmem:[%s246_s7 + $0x8] sm:$0xff]  ;;  %v266_v23 = vld [vmem:[%s246_s7 + $0x30] sm:$0xff] }
  0x1a   : > { %v268_v20 = vpack.c.bf16 %v262_v17, %v260_v16  ;;  %v269_v21 = vpack.c.bf16 %v263_v19, %v261_v18  ;;  %v264_v22 = vld [vmem:[%s246_s7 + $0x20] sm:$0xff]  ;;  %v265_v24 = vld [vmem:[%s246_s7 + $0x28] sm:$0xff]  ;;  %v267_v25 = vld [vmem:[%s246_s7 + $0x38] sm:$0xff]  ;;  %s564_s7 = ssub.s32 (%p976_p5), 5, %s1005_s17 }
  0x1b   : > { %v270_v26 = vpack.c.bf16 %v266_v23, %v264_v22  ;;  %v271_v27 = vpack.c.bf16 %v267_v25, %v265_v24  ;;  %v740_v28 = vld [vmem:[%s1175_s3 + $0x30] sm:$0xf]  ;;  %v785_v29 = vld [vmem:[%s1175_s3 + $0x34] sm:$0xf0]  ;;  %v784_v30 = vld [vmem:[%s1175_s3 + $0x34] sm:$0xf] }
  0x1c   : > { %406 = vmatpush.bf16.msra.mxu0 %v767_v4  ;;  %v741_v31 = vor.u32 %v785_v29, %v740_v28  ;;  %v742_v32 = vld [vmem:[%s1175_s3 + $0x38] sm:$0xf0]  ;;  %v732_v34 = vld [vmem:[%s1175_s3 + $0x20] sm:$0xf]  ;;  %v783_v35 = vld [vmem:[%s1175_s3 + $0x24] sm:$0xf0] }
  0x1d   : > { %425 = vmatpush.bf16.msra.mxu1 %v775_v5  ;;  %v745_v33 = vor.u32 %v784_v30, %v742_v32  ;;  %v782_v36 = vld [vmem:[%s1175_s3 + $0x24] sm:$0xf]  ;;  %v733_v37 = vor.u32 %v783_v35, %v732_v34  ;;  %v734_v38 = vld [vmem:[%s1175_s3 + $0x28] sm:$0xf0]  ;;  %v724_v40 = vld [vmem:[%s1175_s3 + $0x10] sm:$0xf] }
  0x1e   : > { %513 = vmatpush.bf16.msra.mxu2 %v741_v31  ;;  %v737_v39 = vor.u32 %v782_v36, %v734_v38  ;;  %v781_v41 = vld [vmem:[%s1175_s3 + $0x14] sm:$0xf0]  ;;  %v780_v42 = vld [vmem:[%s1175_s3 + $0x14] sm:$0xf]  ;;  %v726_v44 = vld [vmem:[%s1175_s3 + $0x18] sm:$0xf0] }
  0x1f   : > { %532 = vmatpush.bf16.msra.mxu3 %v745_v33  ;;  %v725_v43 = vor.u32 %v781_v41, %v724_v40  ;;  %v729_v45 = vor.u32 %v780_v42, %v726_v44  ;;  %v716_v46 = vld [vmem:[%s1175_s3] sm:$0xf]  ;;  %v779_v47 = vld [vmem:[%s1175_s3 + $0x4] sm:$0xf0]  ;;  %v778_v48 = vld [vmem:[%s1175_s3 + $0x4] sm:$0xf] }
  0x20   : > { %407 = vmatpush.bf16.msra.mxu0 %v766_v6  ;;  %v717_v49 = vor.u32 %v779_v47, %v716_v46  ;;  %v718_v50 = vld [vmem:[%s1175_s3 + $0x8] sm:$0xf0]  ;;  %v829_v54 = vld [vmem:[%s1174_s2] ss:$0 sm:$0xff]  ;;  %p565_p11 = scmp.lt.s32.totalorder (%p976_p5), %s564_s7, 4 }
  0x21   : > { %426 = vmatpush.bf16.msra.mxu1 %v774_v7  ;;  %v721_v51 = vor.u32 %v778_v48, %v718_v50 }
  0x22   : > { %514 = vmatpush.bf16.msra.mxu2 %v733_v37 }
  0x23   : > { %533 = vmatpush.bf16.msra.mxu3 %v737_v39 }
  0x24   : > { %408 = vmatpush.bf16.msra.mxu0 %v765_v8 }
  0x25   : > { %427 = vmatpush.bf16.msra.mxu1 %v773_v9 }
  0x26   : > { %515 = vmatpush.bf16.msra.mxu2 %v725_v43 }
  0x27   : > { %534 = vmatpush.bf16.msra.mxu3 %v729_v45 }
  0x28   : > { %409 = vmatpush.bf16.msra.mxu0 %v764_v10 }
  0x29   : > { %428 = vmatpush.bf16.msra.mxu1 %v772_v11  ;;  %v456_v11 = vld [vmem:[%s1176_s4] sm:$0x3] }
  0x2a   : > { %516 = vmatpush.bf16.msra.mxu2 %v717_v49 }
  0x2b   : > { %535 = vmatpush.bf16.msra.mxu3 %v721_v51 }
  0x2c   : > { %410 = vmatpush.bf16.msra.mxu0 %v763_v12  ;;  %v458_v12 = vperm.slane %v456_v11, 0 }
  0x2d   : > { %429 = vmatpush.bf16.msra.mxu1 %v771_v13  ;;  %v459_v13 = vperm.slane %v456_v11, 1 }
  0x30   : > { %411 = vmatpush.bf16.msra.mxu0 %v762_v14 }
  0x31   : > { %430 = vmatpush.bf16.msra.mxu1 %v770_v15 }
  0x33   : > { %412 = vmatmul.bf16.vlgmr.msra.gmra.mxu0 %v268_v20 }
  0x34   : > { %431 = vmatmul.bf16.vlgmr.msra.gmra.mxu1 %v269_v21 }
  0x43   : > { %417 = vmatmul.bf16.gmra.mxu0 %v270_v26 }
  0x44   : > { %436 = vmatmul.bf16.gmra.mxu1 %v271_v27 }
  0xb0   : > { %v413_v52 = vpop.f32.mrf.mxu0 }
  0xb1   : > { %v432_v53 = vpop.f32.mrf.mxu1  ;;  %v414_v55 = vadd.f32 %v829_v54, %v413_v52 }
  0xb3   : > { %v433_v58 = vadd.f32 %v432_v53, %v414_v55 }
  0xb5   : > { %v442_v61 = vmax.f32 %v433_v58, 0.0 }
  0xb8   : > { %v415_v56 = vpop.f32.mrf.mxu0 }
  0xb9   : > { %v434_v57 = vpop.f32.mrf.mxu1  ;;  %v416_v59 = vadd.f32 %v829_v54, %v415_v56 }
  0xbb   : > { %v435_v60 = vadd.f32 %v434_v57, %v416_v59 }
  0xbd   : > { %v443_v62 = vmax.f32 %v435_v60, 0.0 }
  0xbf   : > { %v446_v63 = vpack.c.bf16 %v443_v62, %v442_v61 }
  0xc0   : > { %v418_v0 = vpop.f32.mrf.mxu0 }
  0xc1   : > { %v437_v1 = vpop.f32.mrf.mxu1  ;;  %746 = vmatmul.msk.bf16.vlgmr.msra.gmra.mxu2 %vm502_vm0, %v446_v63  ;;  %748 = vmatmul.msk.bf16.vlgmr.msra.gmra.mxu3 %vm502_vm0, %v446_v63  ;;  %v419_v2 = vadd.f32 %v829_v54, %v418_v0 }
  0xc3   : > { %v438_v4 = vadd.f32 %v437_v1, %v419_v2 }
  0xc5   : > { %v444_v8 = vmax.f32 %v438_v4, 0.0 }
  0xc8   : > { %v420_v3 = vpop.f32.mrf.mxu0 }
  0xc9   : > { %v421_v5 = vadd.f32 %v829_v54, %v420_v3  ;;  %v439_v6 = vpop.f32.mrf.mxu1 }
  0xcb   : > { %v440_v7 = vadd.f32 %v439_v6, %v421_v5 }
  0xcd   : > { %v445_v9 = vmax.f32 %v440_v7, 0.0 }
  0xcf   : > { %v447_v10 = vpack.c.bf16 %v445_v9, %v444_v8 }
  0xd1   : > { %747 = vmatmul.msk.bf16.gmra.mxu2 %vm502_vm0, %v447_v10  ;;  %749 = vmatmul.msk.bf16.gmra.mxu3 %vm502_vm0, %v447_v10 }
 0x144   : > { %v518_v14 = vpop.f32.mrf.mxu2  ;;  %v537_v15 = vpop.f32.mrf.mxu3 }
 0x145   : > { %v519_v16 = vadd.f32 %v518_v14, %v458_v12  ;;  %v538_v17 = vadd.f32 %v537_v15, %v459_v13 }
 0x147   : > { %v547_v18 = vpack.c.bf16 %v538_v17, %v519_v16 }
 0x149   : > { %551 = vst [vmem:[%s1103_s30] sm:$0xff] %v547_v18 }
 0x14c   : > { %v520_v19 = vpop.f32.mrf.mxu2  ;;  %v539_v20 = vpop.f32.mrf.mxu3 }
 0x14d   : > { %v521_v21 = vadd.f32 %v520_v19, %v458_v12  ;;  %v540_v22 = vadd.f32 %v539_v20, %v459_v13 }
 0x14f   : > { %v548_v23 = vpack.c.bf16 %v540_v22, %v521_v21 }
 0x151   : > { %552 = vst [vmem:[%s1103_s30 + $0x8] sm:$0xff] %v548_v23 }
 0x154   : > { %v523_v24 = vpop.f32.mrf.mxu2  ;;  %v542_v25 = vpop.f32.mrf.mxu3 }
 0x155   : > { %v524_v26 = vadd.f32 %v523_v24, %v458_v12  ;;  %v543_v27 = vadd.f32 %v542_v25, %v459_v13 }
 0x157   : > { %v549_v28 = vpack.c.bf16 %v543_v27, %v524_v26 }
 0x159   : > { %553 = vst [vmem:[%s1103_s30 + $0x10] sm:$0xff] %v549_v28 }
 0x15c   : > { %v525_v29 = vpop.f32.mrf.mxu2  ;;  %v544_v30 = vpop.f32.mrf.mxu3 }
 0x15d   : > { %v526_v31 = vadd.f32 %v525_v29, %v458_v12  ;;  %v545_v32 = vadd.f32 %v544_v30, %v459_v13  ;;  %562 = sbr.rel (!%p976_p5) target bundleno = 385 (0x181), region = 44 }
 0x15f   : > { %v550_v33 = vpack.c.bf16 %v545_v32, %v526_v31 }
 0x161   : > { %554 = vst [vmem:[%s1103_s30 + $0x18] sm:$0xff] %v550_v33 }
 0x162   : > { %s1186_s7 = smov (!%p565_p11, %s564_s7), 4 }
 0x163   : > { %s786_s8 = sshll.u32 %s1186_s7, 3 }
 0x164   : > { %s569_s9 = ssub.s32 32, %s786_s8 }
 0x165   : > { %s570_s11 = sshll.u32 %s569_s9, 4 }
 0x166   : > { %571 = vsyncadd %s1111_s6, %s570_s11  ;;  %p1120_p12 = scmp.ne.s32.totalorder %s786_s8, 0  ;;  %s788_s28 = sshll.u32 %s959_s22, 5 }
 0x167   : > { %s575_s13 = scalar_lea.hbm %s1177_s5, %s788_s28  ;;  %s577_s14 = sshll.u32 %s1103_s30, 4  ;;  %s1129_s14 = int_to_ptr.vmem [resolvable:$true] %s577_s14 }
 0x168   : > { %s579_s15 = sshll.u32 %s575_s13, 4  ;;  %s758_s16 = sshll.u32 %s1186_s7, 7  ;;  %s1131_s15 = int_to_ptr.hbm [resolvable:$true] %s579_s15 }
 0x169   : > { %s830_s23 = sshra.s32 %s1129_s14, 4  ;;  %s832_s25 = sshrl.u32 %s758_s16, 4  ;;  %s831_s23 = int_to_ptr.vmem [resolvable:$true] %s830_s23 }
 0x16a   : > { %s837_s26 = scalar_lea.vmem %s831_s23, %s832_s25  ;;  %s905_s22 = smov [#allocation2]  }
 0x16b   : > { %p838_p13 = scmp.ne.s32.totalorder %s831_s23, %s837_s26  ;;  %s841_s8 = scalar_lea.vmem %s905_s22, 64 }
 0x16c   : > { %p843_p2 = scmp.lt.s32.totalorder %s841_s8, %s837_s26 }
 0x16d   : > { %p839_p0 = pnand %p838_p13, %p1120_p12 }
 0x16f   : > { %p840_p1 = pneg %p839_p0 }
 0x171   : > { %p845_p3 = pnand %p843_p2, %p840_p1 }
 0x173   : > { %848 = shalt.err (!%p845_p3)
}
 0x174   : > { %s849_s30 = sshra.s32 %s1131_s15, 4  ;;  %s860_s12 = scalar_lea.hbm %s1177_s5, 40  ;;  %s850_s30 = int_to_ptr.hbm [resolvable:$true] %s849_s30 }
 0x175   : > { %s856_s9 = scalar_lea.hbm %s850_s30, %s832_s25  ;;  %p861_p8 = scmp.lt.s32.totalorder %s850_s30, %s1177_s5 }
 0x176   : > { %p857_p4 = scmp.ne.s32.totalorder %s850_s30, %s856_s9  ;;  %p862_p9 = scmp.lt.s32.totalorder %s860_s12, %s856_s9 }
 0x178   : > { %p858_p5 = pnand %p857_p4, %p1120_p12  ;;  %p863_p10 = por %p862_p9, %p861_p8 }
 0x17a   : > { %p859_p7 = pneg %p858_p5 }
 0x17c   : > { %p864_p11 = pnand %p863_p10, %p859_p7 }
 0x17e   : > { %867 = shalt.err (!%p864_p11)
}
 0x17f   : > { %s906_s23 = smov 128   ;;  %s907_s25 = smov 8  }
 0x180   : > { %585 = dma.vmem_to_hbm [thread:$0]  (%p1120_p12), %s1129_s14, %s758_s16, %s1131_s15, %s1111_s6, %s906_s23, %s906_s23, %s907_s25  }
 0x181 PF: > { %p794_p13 = scmp.ge.s32.totalorder %s903_s21, 2  ;;  %s594_s26 = sand.u32 1, %s891_s18  }
 0x182   : > { %s595_s22 = scalar_lea.sflag [#allocation3], %s594_s26 }
 0x183   : > { %p791_p0 = pnand %p794_p13, %p980_p6 }
 0x185   : > { %p792_p1 = pneg %p791_p0 }
 0x187   : > { %886 = dma.done.wait (%p792_p1), %s595_s22, 512  }
 0x188   : > { %888 = vsyncadd (%p792_p1), %s595_s22, 4294966784  ;;  %p15_p2 = scmp.ge.s32.totalorder %s963_s24, 4   ;;  %s1181_s18 = smov %s895_s19 }
 0x189   : > { %s1182_s19 = smov %s899_s20  ;;  %s1183_s20 = smov %s974_s27 }
 0x18a   : > { %s1184_s21 = smov %s963_s24  ;;  %17 = sbr.rel (!%p15_p2) target bundleno = 3 (0x3), region = 75 }
 0x18f   :  { %601 = vsyncpa [#allocation3], 1 }
 0x190   :  { %603 = vsyncpa [#allocation3 + $0x1], 1 }

</bundles_post_ra>
